<compile_context>
chip_gen: v5e
topology: v5e:2x2
jax: 0.10.0
libtpu: 0.0.40
codegen_flags: <defaults>
</compile_context>

<pallas_src>
import jax
import jax.numpy as jnp
from jax.experimental import pallas as pl
from jax.experimental.pallas import tpu as pltpu

_LANE = 128


def _h_swish_kernel(x_ref, o_ref):
    # h_sigmoid(x) = relu6(x + 3) / 6 ; h_swish(x) = x * h_sigmoid(x)
    x = x_ref[...].astype(jnp.float32)  # free upcast: kernel is HBM-bound
    hs = jnp.clip(x + 3.0, 0.0, 6.0) * (1.0 / 6.0)
    o_ref[...] = (x * hs).astype(o_ref.dtype)


def _min_sublane(dtype) -> int:
    # minimum sublane tile: 8 for 32-bit, 16 for 16-bit, 32 for 8-bit dtypes
    return max(8, 32 // jnp.dtype(dtype).itemsize)


def h_swish(x: jax.Array, *, tile_bytes: int = 4 * 1024 * 1024,
            donate: bool = False) -> jax.Array:
    """Elementwise hard-swish matching PyTorch h_swish.forward. Any shape/dtype.

    donate=True: caller guarantees x is donated; enables in-place aliasing on
    the zero-copy path (saves the output allocation + writeback bandwidth).
    """
    orig_shape = x.shape
    dtype = x.dtype
    itemsize = jnp.dtype(dtype).itemsize
    sub = _min_sublane(dtype)

    n_elem = x.size
    rows = pl.cdiv(n_elem, _LANE)
    # Only lane (128) alignment is required for the zero-copy path; the row
    # remainder vs. the sublane tile is handled by Pallas partial-block masking.
    aligned = rows * _LANE == n_elem

    if aligned:
        x2d = x.reshape(rows, _LANE)  # contiguous reshape: zero-copy
    else:
        # Rare fallback: element count not a multiple of 128 (usually tiny).
        x_flat = jnp.pad(x.reshape(-1), (0, rows * _LANE - n_elem))
        x2d = x_flat.reshape(rows, _LANE)

    # Block rows: ~tile_bytes per block, but keep >= 2 blocks per TensorCore
    # (v7x shards the "parallel" axis across 2 TCs) so each core can still
    # overlap the next-block read with the previous-block writeback.
    tr = max(sub, tile_bytes // (_LANE * itemsize))
    if rows >= 4 * sub:
        tr = min(tr, max(sub, rows // 4))
    elif rows >= 2 * sub:
        tr = min(tr, max(sub, rows // 2))
    tr = min(tr, rows)
    if tr >= sub:
        tr = (tr // sub) * sub  # keep tr a multiple of the dtype's sublane tile
    # else: tr == rows < sub -> full-extent block (allowed by the (8,128) rule)
    grid = (pl.cdiv(rows, tr),)

    # in + out, double-buffered, plus one tile of headroom; capped below v7x's
    # 64 MiB physical VMEM.
    vmem_limit = min(48 * 1024 * 1024,
                     max(32 * 1024 * 1024, 5 * tr * _LANE * itemsize))

    # Only alias when donation is real and operand 0 is the original buffer
    # (not the padded temp); otherwise XLA adds a defensive full-tensor copy.
    aliases = {0: 0} if (donate and aligned) else {}

    out2d = pl.pallas_call(
        _h_swish_kernel,
        out_shape=jax.ShapeDtypeStruct((rows, _LANE), dtype),
        grid_spec=pltpu.PrefetchScalarGridSpec(
            num_scalar_prefetch=0,
            grid=grid,
            in_specs=[pl.BlockSpec((tr, _LANE), lambda i: (i, 0))],
            out_specs=pl.BlockSpec((tr, _LANE), lambda i: (i, 0)),
        ),
        compiler_params=pltpu.CompilerParams(
            dimension_semantics=("parallel",),
            vmem_limit_bytes=vmem_limit,
        ),
        input_output_aliases=aliases,
        cost_estimate=pl.CostEstimate(
            flops=5 * n_elem,
            transcendentals=0,
            bytes_accessed=2 * n_elem * itemsize,
        ),
    )(x2d)

    if aligned:
        return out2d.reshape(orig_shape)
    return out2d.reshape(-1)[:n_elem].reshape(orig_shape)


if __name__ == "__main__":
    def ref(v):
        vf = v.astype(jnp.float32)
        return (vf * (jnp.clip(vf + 3.0, 0.0, 6.0) / 6.0)).astype(v.dtype)

    key = jax.random.PRNGKey(0)
    k1, k2, k3, k4 = jax.random.split(key, 4)

    # 1) NCHW activation, multiple of 128 and of sub*128 (zero-copy, 2 blocks)
    x1 = jax.random.normal(k1, (2, 4, 16, 16), dtype=jnp.float32) * 4.0
    y1 = h_swish(x1)
    jax.block_until_ready(y1)
    assert y1.shape == x1.shape and y1.dtype == x1.dtype
    assert jnp.allclose(y1, ref(x1), atol=1e-6, rtol=1e-6)

    # 2) multiple of 128 but NOT of sub*128 (relaxed aligned path, rows=3)
    x2 = jax.random.normal(k2, (2, 3, 4, 16), dtype=jnp.float32) * 4.0
    y2 = h_swish(x2)
    jax.block_until_ready(y2)
    assert jnp.allclose(y2, ref(x2), atol=1e-6, rtol=1e-6)

    # 3) truly ragged element count (pad fallback path, partial last block)
    x3 = jax.random.normal(k3, (3, 5, 7, 11), dtype=jnp.float32) * 4.0
    y3 = h_swish(x3)
    jax.block_until_ready(y3)
    assert jnp.allclose(y3, ref(x3), atol=1e-6, rtol=1e-6)

    # 4) bf16 activations (f32 internal math, 16-sublane tiling)
    x4 = (jax.random.normal(k4, (2, 8, 16, 16), dtype=jnp.float32) * 4.0
          ).astype(jnp.bfloat16)
    y4 = h_swish(x4)
    jax.block_until_ready(y4)
    assert y4.shape == x4.shape and y4.dtype == jnp.bfloat16
    assert jnp.allclose(y4.astype(jnp.float32), ref(x4).astype(jnp.float32),
                        atol=0.05, rtol=0.05)

    print("KERNEL_OK")
</pallas_src>

<mosaic_0001>
module attributes {stable_mosaic.version = 11 : i64} {
  func.func @_h_swish_kernel(%arg0: i32, %arg1: memref<8x128xf32, #tpu.memory_space<vmem>>, %arg2: memref<8x128xf32, #tpu.memory_space<vmem>>) attributes {dimension_semantics = [#tpu.dimension_semantics<parallel>], iteration_bounds = array<i64: 2>, scalar_prefetch = 0 : i64, scratch_operands = 0 : i64, tpu.core_type = #tpu.core_type<tc>, window_params = [{transform_indices = @transform_0, window_bounds = array<i64: 8, 128>}, {transform_indices = @transform_1, window_bounds = array<i64: 8, 128>}]} {
    %c0 = arith.constant 0 : index
    %c0_0 = arith.constant 0 : index
    %0 = vector.load %arg1[%c0, %c0_0] : memref<8x128xf32, #tpu.memory_space<vmem>>, vector<8x128xf32>
    %cst = arith.constant 3.000000e+00 : f32
    %1 = vector.broadcast %cst : f32 to vector<8x128xf32>
    %2 = arith.addf %0, %1 : vector<8x128xf32>
    %cst_1 = arith.constant 0.000000e+00 : f32
    %cst_2 = arith.constant 6.000000e+00 : f32
    %3 = vector.broadcast %cst_1 : f32 to vector<8x128xf32>
    %4 = arith.maximumf %3, %2 : vector<8x128xf32>
    %5 = vector.broadcast %cst_2 : f32 to vector<8x128xf32>
    %6 = arith.minimumf %5, %4 : vector<8x128xf32>
    %cst_3 = arith.constant 0.166666672 : f32
    %7 = vector.broadcast %cst_3 : f32 to vector<8x128xf32>
    %8 = arith.mulf %6, %7 : vector<8x128xf32>
    %9 = arith.mulf %0, %8 : vector<8x128xf32>
    %c0_4 = arith.constant 0 : index
    %c0_5 = arith.constant 0 : index
    %10 = vector.load %arg2[%c0_4, %c0_5] : memref<8x128xf32, #tpu.memory_space<vmem>>, vector<8x128xf32>
    tpu.vector_store %arg2[%c0_4, %c0_5], %9 {strides = array<i32>} : memref<8x128xf32, #tpu.memory_space<vmem>>, vector<8x128xf32>,
    return
  }
  func.func @transform_0(%arg0: i32) -> (i32, i32) {
    %c0_i32 = arith.constant 0 : i32
    %c0_i32_0 = arith.constant 0 : i32
    return %arg0, %c0_i32 : i32, i32
  }
  func.func @transform_1(%arg0: i32) -> (i32, i32) {
    %c0_i32 = arith.constant 0 : i32
    %c0_i32_0 = arith.constant 0 : i32
    return %arg0, %c0_i32 : i32, i32
  }
}

</mosaic_0001>

<bundles_post_ra>
// kernel: tpu_custom_call.1
= control target key start
LH: loop header
LB: loop body
LE: loop exit
PB: predicated region body
PF: predicated region fallthrough
CT: control target
= control target key end

     0   :  { %6 = vsyncpa [#allocation3], 0  ;;  %s520_s0 = inlined_call_operand.hbm [shape: f32[16,128], index: 0, kind: input, shape index: {}]   ;;  %s521_s1 = inlined_call_operand.hbm [shape: f32[16,128], index: 1, kind: output, shape index: {}]  }
   0x1   :  { %8 = vsyncpa [#allocation3 + $0x1], 0 }
   0x2   :  { %9 = vsyncpa [#allocation4], 0 }
   0x3   :  { %11 = vsyncpa [#allocation4 + $0x1], 0  ;;  %s393_s6 = smov 0   ;;  %s395_s7 = smov 0  }
   0x4   :  { %s397_s8 = smov 0   ;;  %s399_s9 = smov 0  }
   0x5 LB: > { %s414_s10 = sadd.s32 4294967295, %s381_s9   ;;  %s227_s11 = sadd.s32 4294967294, %s381_s9   ;;  %s381_s9 = sphi %s399_s9, %s531_s9   ;;  %s377_s8 = sphi %s397_s8, %s530_s8   ;;  %s373_s7 = sphi %s395_s7, %s529_s7   ;;  %s369_s6 = sphi %s393_s6, %s528_s6  }
   0x6   : > { %s418_s12 = sadd.s32 1, %s381_s9   ;;  %s24_s13 = sadd.s32 1, %s377_s8 }
   0x7   : > { %s21_s14 = ssub.s32 %s381_s9, %s418_s12  ;;  %p31_p0 = scmp.ne.s32.totalorder %s377_s8, %s373_s7 }
   0x8   : > { %p22_p1 = scmp.eq.s32.totalorder %s21_s14, 0  ;;  %p32_p2 = scmp.eq.s32.totalorder %s381_s9, 0 }
   0x9   : > { %p37_p3 = scmp.ne.s32.totalorder %s373_s7, %s369_s6  ;;  %p38_p4 = scmp.eq.s32.totalorder %s414_s10, 0 }
   0xa   : > { %s430_s15 = scalar_select %p22_p1, %s377_s8, %s24_s13  }
   0xb   : > { %p432_p5 = por %p32_p2, %p31_p0  ;;  %p436_p6 = por %p38_p4, %p37_p3 }
   0xc   : > { %p61_p7 = scmp.eq.s32.totalorder %s414_s10, 1  ;;  %p67_p8 = scmp.eq.s32.totalorder %s227_s11, 1 }
   0xd   : > { %p251_p10 = scmp.lt.s32.totalorder %s381_s9, 2  ;;  %s87_s20 = sand.u32 1, %s377_s8  }
   0xe   : > { %p443_p11 = por %p61_p7, %p31_p0  ;;  %p447_p12 = por %p67_p8, %p37_p3 }
   0xf   : > { %s231_s21 = sshll.u32 %s381_s9, 3  ;;  %s230_s22 = sshll.u32 %s87_s20, 3 }
  0x10   : > { %s95_s25 = scalar_lea.hbm %s520_s0, %s231_s21  ;;  %s91_s27 = scalar_lea.vmem [#allocation2], %s230_s22 }
  0x11   : > { %s97_s26 = sshll.u32 %s95_s25, 4  ;;  %s99_s28 = sshll.u32 %s91_s27, 4  ;;  %s98_s26 = int_to_ptr.hbm [resolvable:$true] %s97_s26  ;;  %s100_s28 = int_to_ptr.vmem [resolvable:$true] %s99_s28 }
  0x12   : > { %p458_p13 = pnand %p251_p10, %p432_p5  ;;  %p232_p0 = scmp.ge.s32.totalorder %s381_s9, 1 }
  0x13   : > { %p104_p1 = scmp.lt.s32.totalorder %s381_s9, 3  ;;  %s88_s30 = scalar_lea.sflag [#allocation3], %s87_s20 }
  0x14   : > { %s285_s2 = sshra.s32 %s98_s26, 4  ;;  %p289_p3 = pneg %p458_p13  ;;  %s286_s2 = int_to_ptr.hbm [resolvable:$true] %s285_s2 }
  0x15   : > { %s287_s3 = scalar_lea.hbm %s286_s2, 8  ;;  %s292_s11 = scalar_lea.hbm %s520_s0, 16 }
  0x16   : > { %p288_p2 = scmp.ne.s32.totalorder %s286_s2, %s287_s3  ;;  %p293_p5 = scmp.lt.s32.totalorder %s286_s2, %s520_s0 }
  0x17   : > { %p294_p8 = scmp.lt.s32.totalorder %s292_s11, %s287_s3 }
  0x18   : > { %p290_p4 = pnand %p289_p3, %p288_p2 }
  0x19   : > { %p295_p10 = por %p294_p8, %p293_p5 }
  0x1a   : > { %p291_p7 = pneg %p290_p4 }
  0x1c   : > { %p296_p9 = pnand %p295_p10, %p291_p7 }
  0x1e   : > { %299 = shalt.err (!%p296_p9)
}
  0x1f   : > { %246 = dma.hbm_to_vmem [thread:$0]  (!%p458_p13), %s98_s26, 128, %s100_s28, %s88_s30  }
  0x20   : > { %p105_p2 = pnand %p232_p0, %p104_p1 }
  0x21   : > { %s479_s16 = sand.u32 (!%p105_p2), 1, %s373_s7  }
  0x22   : > { %108 = sbr.rel (%p105_p2) target bundleno = 55 (0x37), region = 24  ;;  %s233_s20 = sshll.u32 (!%p105_p2), %s479_s16, 3 }
  0x23   : > { %s111_s21 = scalar_lea.sflag (!%p105_p2), [#allocation3], %s479_s16  ;;  %s114_s22 = scalar_lea.vmem (!%p105_p2), [#allocation2], %s233_s20 }
  0x27   : > { %360 = dma.done.wait (%p436_p6), %s111_s21, 128  }
  0x28   : > { %362 = vsyncadd (%p436_p6), %s111_s21, 4294967168  ;;  %v134_v0 = vld [vmem:[%s114_s22] sm:$0xff]  ;;  %s236_s23 = sshll.u32 %s414_s10, 3  ;;  %s133_s27 = scalar_lea.vmem [#allocation5], %s233_s20 }
  0x29   : > { %v135_v1 = vadd.f32 3.0, %v134_v0  ;;  %s152_s26 = scalar_lea.hbm %s521_s1, %s236_s23  ;;  %s154_s28 = sshll.u32 %s133_s27, 4  ;;  %s155_s28 = int_to_ptr.vmem [resolvable:$true] %s154_s28 }
  0x2a   : > { %s156_s29 = sshll.u32 %s152_s26, 4  ;;  %s142_s17 = scalar_lea.sflag [#allocation4], %s479_s16  ;;  %s157_s29 = int_to_ptr.hbm [resolvable:$true] %s156_s29 }
  0x2b   : > { %v136_v2 = vmax.f32 %v135_v1, 0.0  ;;  %s329_s30 = sshra.s32 %s157_s29, 4  ;;  %s335_s4 = scalar_lea.hbm %s521_s1, 16  ;;  %s330_s30 = int_to_ptr.hbm [resolvable:$true] %s329_s30 }
  0x2c   : > { %s331_s10 = scalar_lea.hbm %s330_s30, 8  ;;  %p336_p0 = scmp.lt.s32.totalorder %s330_s30, %s521_s1 }
  0x2d   : > { %v137_v3 = vmin.f32 %v136_v2, 6.0  ;;  %p332_p6 = scmp.ne.s32.totalorder %s330_s30, %s331_s10  ;;  %p337_p1 = scmp.lt.s32.totalorder %s335_s4, %s331_s10 }
  0x2f   : > { %v138_v4 = vmul.f32 0.16666667, %v137_v3  ;;  %p333_p9 = pnand %p332_p6, %p443_p11  ;;  %p338_p3 = por %p337_p1, %p336_p0 }
  0x31   : > { %v139_v5 = vmul.f32 %v138_v4, %v134_v0  ;;  %p334_p13 = pneg %p333_p9 }
  0x33   : > { %140 = vst [vmem:[%s133_s27] sm:$0xff] %v139_v5  ;;  %p339_p4 = pnand %p338_p3, %p334_p13 }
  0x35   : > { %342 = shalt.err (!%p339_p4)
}
  0x36   : > { %241 = dma.vmem_to_hbm [thread:$0]  (%p443_p11), %s155_s28, 128, %s157_s29, %s142_s17  }
  0x37 PF: > { %s168_s13 = sand.u32 1, %s369_s6   ;;  %p527_p7 = scmp.ge.s32.totalorder %s381_s9, 2 }
  0x38   : > { %s169_s14 = scalar_lea.sflag [#allocation4], %s168_s13 }
  0x39   : > { %p248_p5 = pnand %p527_p7, %p447_p12 }
  0x3b   : > { %p249_p8 = pneg %p248_p5 }
  0x3d   : > { %364 = dma.done.wait (%p249_p8), %s169_s14, 128  }
  0x3e   : > { %366 = vsyncadd (%p249_p8), %s169_s14, 4294967168  ;;  %p14_p10 = scmp.ge.s32.totalorder %s418_s12, 4   ;;  %s528_s6 = smov %s373_s7 }
  0x3f   : > { %s529_s7 = smov %s377_s8  ;;  %s530_s8 = smov %s430_s15 }
  0x40   : > { %s531_s9 = smov %s418_s12  ;;  %16 = sbr.rel (!%p14_p10) target bundleno = 5 (0x5), region = 69 }
  0x45   :  { %175 = vsyncpa [#allocation3], 1 }
  0x46   :  { %177 = vsyncpa [#allocation3 + $0x1], 1 }
  0x47   :  { %178 = vsyncpa [#allocation4], 1 }
  0x48   :  { %180 = vsyncpa [#allocation4 + $0x1], 1 }

</bundles_post_ra>
